<compile_context>
chip_gen: v7x
topology: tpu7x:2x2x1
jax: 0.10.0
libtpu: 0.0.40
codegen_flags: <defaults>
</compile_context>

<pallas_src>
import functools
import math

import jax
import jax.numpy as jnp
import numpy as np
from jax.experimental import pallas as pl
from jax.experimental.pallas import tpu as pltpu

ACTIVATION_BIT = 8
MOMENTUM = 0.99

_LANE_CANDIDATES = (512, 256, 128)   # lane-dense last dims (multiples of 128)


def _cdiv(a, b):
    return -(-a // b)


def _round_up(a, m):
    return _cdiv(a, m) * m


def _tpu_info():
    """(vmem_capacity_bytes, is_v7x) with conservative fallbacks."""
    vmem_cap = 64 << 20          # conservative default (v7x-sized VMEM)
    is_v7 = False
    try:
        info = pltpu.get_tpu_info()
        vmem_cap = int(getattr(info, "vmem_capacity_bytes", vmem_cap))
    except Exception:
        pass
    try:
        kind = jax.devices()[0].device_kind.lower()
        is_v7 = ("v7" in kind) or ("7x" in kind)
    except Exception:
        pass
    return vmem_cap, is_v7


def _sublane_quantum(dtype):
    # native (sublane, 128) tile second-minor: 8 for f32, 16 for bf16, 32 for int8
    return {4: 8, 2: 16, 1: 32}.get(jnp.dtype(dtype).itemsize, 8)


def _fill_values(dtype):
    """(identity-for-min, identity-for-max) sentinels in the input dtype."""
    if jnp.issubdtype(dtype, jnp.floating):
        big = jnp.array(jnp.inf, dtype)
        return big, -big
    info = jnp.iinfo(dtype)
    return jnp.array(info.max, dtype), jnp.array(info.min, dtype)


# ------------------------------------------------------------------
# Pass 1: per-block partial min/max.
# ------------------------------------------------------------------
def _minmax_small_kernel(x_ref, min_ref, max_ref):
    """Single tiny block (rows <= 8): lane-fold to (rows, 128) partials."""
    x = x_ref[...].astype(jnp.float32)
    lane = x.shape[1]
    strips = [x[:, i * 128:(i + 1) * 128] for i in range(lane // 128)]
    min_ref[...] = functools.reduce(jnp.minimum, strips)
    max_ref[...] = functools.reduce(jnp.maximum, strips)


def _minmax_stream_kernel(x_ref, min_ref, max_ref, *, gsub, total_rows, needs_mask):
    """Streamed per-block partial min/max in (gsub, LANE) native-tile groups.

    Out-of-range rows of a partial boundary block (unspecified VMEM contents)
    are masked with +/-inf, so the wrapper never materializes a padded copy.
    """
    tr, lane = x_ref.shape
    n_groups = tr // gsub                     # tr % gsub == 0 by construction

    if needs_mask:
        fill_min, fill_max = _fill_values(x_ref.dtype)
        row_iota = jax.lax.broadcasted_iota(jnp.int32, (gsub, lane), 0)  # hoisted
        row_base = pl.program_id(0) * tr

    def load_group(s):
        start = pl.multiple_of(s * gsub, gsub)
        blk = x_ref[pl.ds(start, gsub), :]
        if not needs_mask:
            return blk, blk
        valid = (row_base + s * gsub + row_iota) < total_rows
        return jnp.where(valid, blk, fill_min), jnp.where(valid, blk, fill_max)

    mn, mx = load_group(0)

    def body(s, carry):
        cmn, cmx = carry
        b_lo, b_hi = load_group(s)
        return jnp.minimum(cmn, b_lo), jnp.maximum(cmx, b_hi)

    mn, mx = jax.lax.fori_loop(1, n_groups, body, (mn, mx), unroll=8)

    # Finish the reduction in-kernel: fold sublanes down to 8 rows (f32 tile)
    # and lanes down to 128 -> (8, 128) f32 partial per block.
    mn = mn.astype(jnp.float32)
    mx = mx.astype(jnp.float32)
    r = gsub
    while r > 8:
        r //= 2
        mn = jnp.minimum(mn[:r], mn[r:])
        mx = jnp.maximum(mx[:r], mx[r:])
    strips_mn = [mn[:, i * 128:(i + 1) * 128] for i in range(lane // 128)]
    strips_mx = [mx[:, i * 128:(i + 1) * 128] for i in range(lane // 128)]
    min_ref[...] = functools.reduce(jnp.minimum, strips_mn)
    max_ref[...] = functools.reduce(jnp.maximum, strips_mx)


# ------------------------------------------------------------------
# Pass 2: symmetric fake quantization (quantize + clamp + dequantize).
#   n     = 2^(bit-1) - 1
#   scale = max(|x_min|, |x_max|).clamp(min=1e-8) / n
#   out   = clamp(round(x * (1/scale)), -n, n-1) * scale
# ------------------------------------------------------------------
def _quantize_kernel(qp_ref, x_ref, out_ref, *, n_levels):
    # qp_ref: (2,) f32 in SMEM = [scale, 1/scale]
    x = x_ref[...].astype(jnp.float32)
    q = jnp.clip(jnp.round(x * qp_ref[1]), -n_levels, n_levels - 1.0)
    out_ref[...] = (q * qp_ref[0]).astype(out_ref.dtype)


# ------------------------------------------------------------------
# Wrapper-side planning
# ------------------------------------------------------------------
def _lane_dense_view(x):
    """Lane-dense 2-D (rows, lane) view of x; zero-copy whenever possible."""
    total = math.prod(x.shape)
    for lane in _LANE_CANDIDATES:
        if total % lane == 0:
            return x.reshape(total // lane, lane), lane, total, False
    # TODO(synk): ragged fallback still pads with x.flat[0] (one extra copy of
    # x); only reached when numel is not a multiple of 128.
    lane = 128
    padded = _round_up(total, lane)
    x_flat = x.reshape(-1)
    x_flat = jnp.concatenate(
        [x_flat, jnp.broadcast_to(x_flat[:1], (padded - total,))])
    return x_flat.reshape(padded // lane, lane), lane, total, True


def _plan_tiles(rows, lane, itemsize, gsub, vmem_cap, is_v7):
    """Pick (block_rows, grid) for the (rows, lane) 2-D view."""
    if rows <= 8:
        return rows, 1                              # one tiny full-array block
    # 8 MiB blocks on 128-MiB-VMEM chips (v5e/v6e), 4 MiB on v7x / unknown.
    blk_target = (8 << 20) if vmem_cap >= (96 << 20) else (4 << 20)
    tr_max = max(gsub, (blk_target // (lane * itemsize)) // gsub * gsub)
    grid = _cdiv(rows, tr_max)
    if is_v7 and rows >= 2 * gsub:
        grid = _round_up(max(grid, 2), 2)           # keep both TensorCores busy
    tr = _round_up(_cdiv(rows, grid), gsub)
    grid = _cdiv(rows, tr)
    return tr, grid


def _global_min_max(x2d, tr, grid, gsub, semantics, vmem_limit):
    rows, lane = x2d.shape
    if grid == 1 and tr == rows and rows <= 8:
        kernel = _minmax_small_kernel
        out_rows = rows
    else:
        kernel = functools.partial(_minmax_stream_kernel, gsub=gsub,
                                   total_rows=rows,
                                   needs_mask=(grid * tr != rows))
        out_rows = 8
    pmin, pmax = pl.pallas_call(
        kernel,
        out_shape=(jax.ShapeDtypeStruct((grid * out_rows, 128), jnp.float32),
                   jax.ShapeDtypeStruct((grid * out_rows, 128), jnp.float32)),
        grid=(grid,),
        in_specs=[pl.BlockSpec((tr, lane), lambda i: (i, 0))],
        out_specs=(pl.BlockSpec((out_rows, 128), lambda i: (i, 0)),
                   pl.BlockSpec((out_rows, 128), lambda i: (i, 0))),
        compiler_params=pltpu.CompilerParams(
            dimension_semantics=semantics,
            vmem_limit_bytes=vmem_limit),
    )(x2d)
    # tiny final reduce in plain JAX
    return jnp.min(pmin), jnp.max(pmax)


def quant_act_forward(x, x_min_buf, x_max_buf,
                      activation_bit=ACTIVATION_BIT,
                      momentum=MOMENTUM,
                      full_precision_flag=False,
                      running_stat=True):
    """Functional QuantAct.forward (symmetric mode).

    The PyTorch module mutates its registered buffers in place; here the
    updated (x_min, x_max) buffers are returned alongside the output.
    """
    # TODO(synk): percentile=True (get_percentile_min_max) needs a sort; not implemented.
    # TODO(synk): quant_mode='asymmetric' not implemented (module default is symmetric).
    orig_shape = x.shape
    orig_dtype = x.dtype

    x2d, lane, total, ragged = _lane_dense_view(x)
    rows = x2d.shape[0]
    itemsize = jnp.dtype(orig_dtype).itemsize
    gsub = _sublane_quantum(orig_dtype)

    vmem_cap, is_v7 = _tpu_info()
    tr, grid = _plan_tiles(rows, lane, itemsize, gsub, vmem_cap, is_v7)
    core_par = getattr(pltpu, "CORE_PARALLEL", "parallel")
    semantics = ((core_par,) if (is_v7 and grid > 1) else ("parallel",))
    blk_bytes = tr * lane * itemsize

    x_min_buf = x_min_buf.astype(jnp.float32)
    x_max_buf = x_max_buf.astype(jnp.float32)

    # ---- running-stat buffer update (scalar bookkeeping in plain JAX) ----
    if running_stat:
        cur_min, cur_max = _global_min_max(
            x2d, tr, grid, gsub, semantics,
            vmem_limit=max(8 << 20, 2 * blk_bytes + (4 << 20)))
        same = (x_min_buf == x_max_buf)
        new_min = jnp.where(same, x_min_buf + cur_min,
                            momentum * x_min_buf + (1.0 - momentum) * cur_min)
        new_max = jnp.where(same, x_max_buf + cur_max,
                            momentum * x_max_buf + (1.0 - momentum) * cur_max)
    else:
        new_min, new_max = x_min_buf, x_max_buf

    if full_precision_flag:
        return x, new_min, new_max

    # ---- symmetric quantization parameters (scalars) ----
    # TODO(synk): clamp range is [-n, n-1] as in portable_quantizer's
    # SymmetricQuantFunction; flip to [-n-1, n] if the target repo differs.
    n_levels = float(2 ** (activation_bit - 1) - 1)
    max_abs = jnp.maximum(jnp.abs(new_min), jnp.abs(new_max))
    scale = (jnp.maximum(max_abs, 1e-8) / n_levels).astype(jnp.float32)    # (1,)
    qparams = jnp.concatenate([scale, 1.0 / scale]).astype(jnp.float32)    # (2,)

    # ---- pass 2: elementwise fake-quantization ----
    # TODO(synk): consider input_output_aliases when the caller can donate x.
    out2d = pl.pallas_call(
        functools.partial(_quantize_kernel, n_levels=n_levels),
        out_shape=jax.ShapeDtypeStruct((rows, lane), orig_dtype),
        grid=(grid,),
        in_specs=[pl.BlockSpec(memory_space=pltpu.MemorySpace.SMEM),
                  pl.BlockSpec((tr, lane), lambda i: (i, 0))],
        out_specs=pl.BlockSpec((tr, lane), lambda i: (i, 0)),
        compiler_params=pltpu.CompilerParams(
            dimension_semantics=semantics,
            vmem_limit_bytes=max(8 << 20, 4 * blk_bytes + (4 << 20))),
    )(qparams, x2d)

    if ragged:
        out = out2d.reshape(-1)[:total].reshape(orig_shape)
    else:
        out = out2d.reshape(orig_shape)               # zero-copy
    return out, new_min, new_max


# ------------------------------------------------------------------
# Pure-JAX reference + demo
# ------------------------------------------------------------------
def _reference(x, x_min_buf, x_max_buf, activation_bit, momentum):
    cur_min, cur_max = jnp.min(x), jnp.max(x)
    same = (x_min_buf == x_max_buf)
    new_min = jnp.where(same, x_min_buf + cur_min,
                        momentum * x_min_buf + (1.0 - momentum) * cur_min)
    new_max = jnp.where(same, x_max_buf + cur_max,
                        momentum * x_max_buf + (1.0 - momentum) * cur_max)
    n = float(2 ** (activation_bit - 1) - 1)
    scale = jnp.maximum(jnp.maximum(jnp.abs(new_min[0]), jnp.abs(new_max[0])),
                        1e-8) / n
    q = jnp.clip(jnp.round(x.astype(jnp.float32) * (1.0 / scale)), -n, n - 1.0)
    return (q * scale).astype(x.dtype), new_min, new_max


def _check(x, bufs, name):
    xmin, xmax = bufs
    out, nmin, nmax = quant_act_forward(x, xmin, xmax)
    out = jax.block_until_ready(out)
    ref_out, ref_min, ref_max = _reference(x, xmin, xmax, ACTIVATION_BIT, MOMENTUM)
    assert np.allclose(np.asarray(out), np.asarray(ref_out), atol=1e-5), name
    assert np.allclose(np.asarray(nmin), np.asarray(ref_min), atol=1e-6), name
    assert np.allclose(np.asarray(nmax), np.asarray(ref_max), atol=1e-6), name
    return nmin, nmax


if __name__ == "__main__":
    key = jax.random.PRNGKey(0)
    k1, k2, k3 = jax.random.split(key, 3)

    # NCHW activation consistent with the module (batch=2, channels=4, 16x16).
    x = jax.random.normal(k1, (2, 4, 16, 16), dtype=jnp.float32)
    xmin = jnp.zeros((1,), jnp.float32)   # registered buffers: torch.zeros(1)
    xmax = jnp.zeros((1,), jnp.float32)

    # first call: buffers equal -> "same" branch
    nmin, nmax = _check(x, (xmin, xmax), "call1")
    # second call: buffers differ -> momentum branch
    nmin, nmax = _check(x, (nmin, nmax), "call2")

    # larger activation: exercises the streamed fori_loop pass-1 kernel
    x_big = jax.random.normal(k2, (8, 32, 28, 28), dtype=jnp.float32)
    _check(x_big, (jnp.zeros((1,), jnp.float32), jnp.zeros((1,), jnp.float32)),
           "big")

    # ragged numel: exercises the boundary-block / in-kernel row-masking path
    x_odd = jax.random.normal(k3, (3, 5, 7, 11), dtype=jnp.float32)
    _check(x_odd, (jnp.zeros((1,), jnp.float32), jnp.zeros((1,), jnp.float32)),
           "odd")

    print("KERNEL_OK")
</pallas_src>

<mosaic_0001>
module attributes {stable_mosaic.version = 11 : i64} {
  func.func @_minmax_small_kernel(%arg0: i32, %arg1: memref<4x512xf32, #tpu.memory_space<vmem>>, %arg2: memref<4x128xf32, #tpu.memory_space<vmem>>, %arg3: memref<4x128xf32, #tpu.memory_space<vmem>>) attributes {dimension_semantics = [#tpu.dimension_semantics<parallel>], iteration_bounds = array<i64: 1>, scalar_prefetch = 0 : i64, scratch_operands = 0 : i64, tpu.core_type = #tpu.core_type<tc>, window_params = [{transform_indices = @transform_0, window_bounds = array<i64: 4, 512>}, {transform_indices = @transform_1, window_bounds = array<i64: 4, 128>}, {transform_indices = @transform_2, window_bounds = array<i64: 4, 128>}]} {
    %c0 = arith.constant 0 : index
    %c0_0 = arith.constant 0 : index
    %0 = vector.load %arg1[%c0, %c0_0] : memref<4x512xf32, #tpu.memory_space<vmem>>, vector<4x512xf32>
    %1 = vector.extract_strided_slice %0 {offsets = [0, 0], sizes = [4, 128], strides = [1, 1]} : vector<4x512xf32> to vector<4x128xf32>
    %2 = vector.extract_strided_slice %0 {offsets = [0, 128], sizes = [4, 128], strides = [1, 1]} : vector<4x512xf32> to vector<4x128xf32>
    %3 = vector.extract_strided_slice %0 {offsets = [0, 256], sizes = [4, 128], strides = [1, 1]} : vector<4x512xf32> to vector<4x128xf32>
    %4 = vector.extract_strided_slice %0 {offsets = [0, 384], sizes = [4, 128], strides = [1, 1]} : vector<4x512xf32> to vector<4x128xf32>
    %5 = arith.minimumf %1, %2 : vector<4x128xf32>
    %6 = arith.minimumf %5, %3 : vector<4x128xf32>
    %7 = arith.minimumf %6, %4 : vector<4x128xf32>
    %c0_1 = arith.constant 0 : index
    %c0_2 = arith.constant 0 : index
    %8 = vector.load %arg2[%c0_1, %c0_2] : memref<4x128xf32, #tpu.memory_space<vmem>>, vector<4x128xf32>
    tpu.vector_store %arg2[%c0_1, %c0_2], %7 {strides = array<i32>} : memref<4x128xf32, #tpu.memory_space<vmem>>, vector<4x128xf32>,
    %9 = arith.maximumf %1, %2 : vector<4x128xf32>
    %10 = arith.maximumf %9, %3 : vector<4x128xf32>
    %11 = arith.maximumf %10, %4 : vector<4x128xf32>
    %c0_3 = arith.constant 0 : index
    %c0_4 = arith.constant 0 : index
    %12 = vector.load %arg3[%c0_3, %c0_4] : memref<4x128xf32, #tpu.memory_space<vmem>>, vector<4x128xf32>
    tpu.vector_store %arg3[%c0_3, %c0_4], %11 {strides = array<i32>} : memref<4x128xf32, #tpu.memory_space<vmem>>, vector<4x128xf32>,
    return
  }
  func.func @transform_0(%arg0: i32) -> (i32, i32) {
    %c0_i32 = arith.constant 0 : i32
    %c0_i32_0 = arith.constant 0 : i32
    return %arg0, %c0_i32 : i32, i32
  }
  func.func @transform_1(%arg0: i32) -> (i32, i32) {
    %c0_i32 = arith.constant 0 : i32
    %c0_i32_0 = arith.constant 0 : i32
    return %arg0, %c0_i32 : i32, i32
  }
  func.func @transform_2(%arg0: i32) -> (i32, i32) {
    %c0_i32 = arith.constant 0 : i32
    %c0_i32_0 = arith.constant 0 : i32
    return %arg0, %c0_i32 : i32, i32
  }
}

</mosaic_0001>

<bundles_post_ra>
// kernel: tpu_custom_call.1
= control target key start
LH: loop header
LB: loop body
LE: loop exit
PB: predicated region body
PF: predicated region fallthrough
CT: control target
= control target key end

     0   :  { %8 = vsyncpa [#allocation3], 0  ;;  %s198_s0 = inlined_call_operand.hbm [shape: f32[4,512], index: 0, kind: input, shape index: {}]   ;;  %s199_s1 = inlined_call_operand.hbm [shape: f32[4,128], index: 1, kind: output, shape index: {0}]   ;;  %s200_s2 = inlined_call_operand.hbm [shape: f32[4,128], index: 2, kind: output, shape index: {1}]  }
   0x1   :  { %9 = vsyncpa [#allocation4], 0 }
   0x2   :  { %10 = vsyncpa [#allocation7], 0  ;;  %s144_s9 = smov [#allocation2]   ;;  %s72_s13 = scalar_lea.hbm %s198_s0, 256 }
   0x3   :  { %s17_s10 = sshll.u32 %s144_s9, 4  ;;  %p73_p0 = scmp.ne.s32.totalorder %s198_s0, %s72_s13  ;;  %s18_s10 = int_to_ptr.vmem [resolvable:$true] %s17_s10 }
   0x4   :  { %p76_p1 = scmp.lt.u32.totalorder %s72_s13, %s198_s0 }
   0x6   :  { %p78_p2 = pnand %p76_p1, %p73_p0 }
   0x8   :  { %81 = shalt.err (!%p78_p2)
}
   0x9   :  { %s82_s18 = scalar_lea.vmem %s18_s10, 256  ;;  %p87_p4 = scmp.lt.s32.totalorder %s18_s10, %s18_s10 }
   0xa   :  { %p83_p3 = scmp.ne.s32.totalorder %s18_s10, %s82_s18  ;;  %p88_p5 = scmp.lt.s32.totalorder %s82_s18, %s82_s18 }
   0xc   :  { %p89_p6 = por %p88_p5, %p87_p4 }
   0xe   :  { %p90_p7 = pnand %p89_p6, %p83_p3 }
  0x10   :  { %93 = shalt.err (!%p90_p7)
}
  0x11   :  { %20 = dma.hbm_to_vmem [thread:$0]  %s198_s0, 256, %s18_s10, [#allocation3]  }
  0x12   :  { %138 = dma.done.wait [#allocation3], 256  }
  0x13   :  { %139 = vsyncadd [#allocation3], 4294967040  ;;  %v24_v0 = vld [vmem:[#allocation2] sm:$0xff]  ;;  %v25_v1 = vld [vmem:[#allocation2 + $0x8] sm:$0xff]  ;;  %s145_s21 = smov [#allocation5]   ;;  %s146_s23 = smov [#allocation6]  }
  0x14   :  { %v27_v2 = vrot.slane %v24_v0, 4  ;;  %v32_v4 = vrot.slane %v25_v1, 4  ;;  %s46_s22 = sshll.u32 %s145_s21, 4  ;;  %s56_s24 = sshll.u32 %s146_s23, 4  ;;  %s47_s22 = int_to_ptr.vmem [resolvable:$true] %s46_s22  ;;  %s57_s24 = int_to_ptr.vmem [resolvable:$true] %s56_s24 }
  0x15   :  { %s94_s0 = scalar_lea.vmem %s47_s22, 64  ;;  %p99_p9 = scmp.lt.s32.totalorder %s47_s22, %s47_s22 }
  0x16   :  { %v29_v3 = vmin.f32 %v24_v0, %v27_v2  ;;  %v36_v5 = vmax.f32 %v24_v0, %v27_v2  ;;  %p95_p8 = scmp.ne.s32.totalorder %s47_s22, %s94_s0  ;;  %p100_p10 = scmp.lt.s32.totalorder %s94_s0, %s94_s0 }
  0x18   :  { %v30_v6 = vmin.f32 %v29_v3, %v25_v1  ;;  %v37_v7 = vmax.f32 %v36_v5, %v25_v1  ;;  %p101_p11 = por %p100_p10, %p99_p9 }
  0x1a   :  { %v34_v8 = vmin.f32 %v30_v6, %v32_v4  ;;  %v38_v9 = vmax.f32 %v37_v7, %v32_v4  ;;  %p102_p12 = pnand %p101_p11, %p95_p8 }
  0x1c   :  { %35 = vst [vmem:[#allocation5] sm:$0xf] %v34_v8  ;;  %39 = vst [vmem:[#allocation6] sm:$0xf] %v38_v9 }
  0x1d   :  { %105 = shalt.err (!%p102_p12)
}
  0x1e   :  { %s106_s27 = scalar_lea.hbm %s199_s1, 64 }
  0x1f   :  { %p107_p13 = scmp.ne.s32.totalorder %s199_s1, %s106_s27  ;;  %p110_p0 = scmp.lt.u32.totalorder %s106_s27, %s199_s1 }
  0x21   :  { %p112_p1 = pnand %p110_p0, %p107_p13 }
  0x23   :  { %115 = shalt.err (!%p112_p1)
}
  0x24   :  { %49 = dma.vmem_to_hbm [thread:$0]  %s47_s22, 64, %s199_s1, [#allocation4]  }
  0x25   :  { %s116_s6 = scalar_lea.vmem %s57_s24, 64  ;;  %p121_p3 = scmp.lt.s32.totalorder %s57_s24, %s57_s24 }
  0x26   :  { %p117_p2 = scmp.ne.s32.totalorder %s57_s24, %s116_s6  ;;  %p122_p4 = scmp.lt.s32.totalorder %s116_s6, %s116_s6 }
  0x28   :  { %p123_p5 = por %p122_p4, %p121_p3 }
  0x2a   :  { %p124_p6 = pnand %p123_p5, %p117_p2 }
  0x2c   :  { %127 = shalt.err (!%p124_p6)
}
  0x2d   :  { %s128_s9 = scalar_lea.hbm %s200_s2, 64 }
  0x2e   :  { %p129_p7 = scmp.ne.s32.totalorder %s200_s2, %s128_s9  ;;  %p132_p8 = scmp.lt.u32.totalorder %s128_s9, %s200_s2 }
  0x30   :  { %p134_p9 = pnand %p132_p8, %p129_p7 }
  0x32   :  { %137 = shalt.err (!%p134_p9)
}
  0x33   :  { %59 = dma.vmem_to_hbm [thread:$0]  %s57_s24, 64, %s200_s2, [#allocation7]  }
  0x34   :  { %140 = dma.done.wait [#allocation4], 64  }
  0x35   :  { %141 = vsyncadd [#allocation4], 4294967232 }
  0x36   :  { %142 = dma.done.wait [#allocation7], 64  }
  0x37   :  { %143 = vsyncadd [#allocation7], 4294967232 }
  0x38   :  { %66 = vsyncpa [#allocation3], 1 }
  0x39   :  { %67 = vsyncpa [#allocation4], 1 }
  0x3a   :  { %68 = vsyncpa [#allocation7], 1 }

</bundles_post_ra>
